<compile_context>
chip_gen: v7x
topology: tpu7x:2x2x1
jax: 0.10.0
libtpu: 0.0.40
codegen_flags: <defaults>
</compile_context>

<pallas_src>
import jax
import jax.numpy as jnp
from jax import lax
from jax.experimental import pallas as pl
from jax.experimental.pallas import tpu as pltpu


def dual_attention_kernel(x_ref, w1_ref, w2_ref, t_ref, o_ref):
    # x_ref : (Bt, C, HW)  VMEM block (lane-dense, HW multiple of 128)
    # w1_ref: (C//r, C)    VMEM (PyTorch Linear #1 weight layout)
    # w2_ref: (C, C//r)    VMEM (PyTorch Linear #2 weight layout)
    # t_ref : (HW, HW)     VMEM Toeplitz matrix of the 7x7 / pad-3 conv
    # o_ref : (Bt, C, HW)  VMEM output block
    x = x_ref[...].astype(jnp.float32)                       # (Bt, C, HW)
    bt, c, hw = x.shape

    # ---------------- channel attention (tiny MLP, kept on the VPU) ----------------
    pooled = jnp.mean(x, axis=-1)                             # (Bt, C)   lane reduce
    w1 = w1_ref[...]                                          # (CR, C)
    w2 = w2_ref[...]                                          # (C, CR)
    h1 = jnp.maximum(
        jnp.sum(pooled[:, None, :] * w1[None, :, :], axis=-1), 0.0)      # (Bt, CR)
    cw = jax.nn.sigmoid(
        jnp.sum(h1[:, None, :] * w2[None, :, :], axis=-1))               # (Bt, C)

    # ------- channel-weighted spatial mean, fused into one batched MXU matmul ------
    # m[b, s] = sum_c (cw[b, c] / C) * x[b, c, s]
    cw_over_c = cw * (1.0 / c)                                # (Bt, C)
    m = jnp.einsum('bmc,bcs->bms', cw_over_c[:, None, :], x,
                   preferred_element_type=jnp.float32)[:, 0, :]          # (Bt, HW)

    # -------- 7x7 conv (pad 3, no bias) as a lane-dense (HW, HW) MXU matmul --------
    sw = jax.nn.sigmoid(
        jnp.dot(m, t_ref[...], preferred_element_type=jnp.float32))      # (Bt, HW)

    # --------- fused output: one elementwise pass, lane-dense unmasked store -------
    o_ref[...] = (x * cw[:, :, None] * sw[:, None, :]).astype(o_ref.dtype)


def _conv7x7_toeplitz(wc, h, w):
    """Dense (H*W, H*W) matrix T with conv_out_flat = m_flat @ T.

    T[yi*W+xi, yo*W+xo] = wc[yi-yo+3, xi-xo+3] when |yi-yo|<=3 and |xi-xo|<=3,
    else 0 — i.e. zero-padded cross-correlation, identical to nn.Conv2d(1,1,7,pad=3).
    """
    k = wc.reshape(7, 7).astype(jnp.float32)
    yi = jnp.arange(h)[:, None, None, None]
    xi = jnp.arange(w)[None, :, None, None]
    yo = jnp.arange(h)[None, None, :, None]
    xo = jnp.arange(w)[None, None, None, :]
    dy = yi - yo + 3
    dx = xi - xo + 3
    valid = (dy >= 0) & (dy < 7) & (dx >= 0) & (dx < 7)
    taps = k[jnp.clip(dy, 0, 6), jnp.clip(dx, 0, 6)]
    t = jnp.where(valid, taps, jnp.float32(0.0))              # (H, W, H, W)
    return t.reshape(h * w, h * w)


def _pick_batch_tile(b, c, hw, itemsize, vmem_budget_bytes=16 * 1024 * 1024):
    """Largest batch tile that (a) fits the VMEM budget (double-buffered in+out,
    with headroom for the Toeplitz matrix / intermediates), (b) divides B, and
    (c) leaves >= 2 grid steps when B >= 2 (both v7x TensorCores get work)."""
    per_image = c * hw * itemsize
    cap = max(1, vmem_budget_bytes // (6 * per_image))
    bt = int(min(b, cap))
    if b >= 2:
        bt = max(1, min(bt, b // 2))
    while b % bt:
        bt -= 1
    return bt


def dual_attention(x, w1, w2, wc, *, batch_tile=None,
                   vmem_limit_bytes=32 * 1024 * 1024):
    """x: (B, C, H, W); w1: (C//r, C); w2: (C, C//r); wc: (1, 1, 7, 7)."""
    b, c, h, w = x.shape
    hw = h * w
    cr = w1.shape[0]

    x_flat = x.reshape(b, c, hw)                              # lane-dense layout
    t = _conv7x7_toeplitz(wc, h, w)                           # (HW, HW)

    if batch_tile is None:
        batch_tile = _pick_batch_tile(b, c, hw, jnp.dtype(x.dtype).itemsize)
    bt = int(batch_tile)
    assert b % bt == 0, (b, bt)

    out_flat = pl.pallas_call(
        dual_attention_kernel,
        out_shape=jax.ShapeDtypeStruct((b, c, hw), x.dtype),
        grid=(b // bt,),
        in_specs=[
            pl.BlockSpec((bt, c, hw), lambda i: (i, 0, 0)),   # x (lane-dense)
            pl.BlockSpec((cr, c), lambda i: (0, 0)),          # resident across steps
            pl.BlockSpec((c, cr), lambda i: (0, 0)),
            pl.BlockSpec((hw, hw), lambda i: (0, 0)),         # Toeplitz conv matrix
        ],
        out_specs=pl.BlockSpec((bt, c, hw), lambda i: (i, 0, 0)),
        compiler_params=pltpu.CompilerParams(
            dimension_semantics=("parallel",),
            vmem_limit_bytes=vmem_limit_bytes,
        ),
    )(x_flat, w1, w2, t)
    return out_flat.reshape(b, c, h, w)


def dual_attention_reference(x, w1, w2, wc):
    """Pure-JAX reference mirroring the PyTorch forward exactly."""
    b, c, h, w_ = x.shape
    pooled = x.reshape(b, c, -1).mean(axis=2)                     # (b, c)
    hid = jax.nn.relu(pooled @ w1.T)                              # (b, c//r)
    cw = jax.nn.sigmoid(hid @ w2.T)                               # (b, c)
    xc = x * cw[:, :, None, None]
    m = xc.mean(axis=1, keepdims=True)                            # (b, 1, h, w)
    conv = lax.conv_general_dilated(
        m, wc, window_strides=(1, 1), padding=((3, 3), (3, 3)),
        dimension_numbers=("NCHW", "OIHW", "NCHW"))
    sw = jax.nn.sigmoid(conv)
    return xc * sw


if __name__ == "__main__":
    B, C, H, W = 2, 32, 16, 16
    reduction = 8
    CR = C // reduction

    key = jax.random.PRNGKey(0)
    kx, k1, k2, k3 = jax.random.split(key, 4)

    x = jax.random.normal(kx, (B, C, H, W), dtype=jnp.float32)
    # deterministic synthetic parameters (PyTorch weight layouts):
    w1 = 0.1 * jax.random.normal(k1, (CR, C), dtype=jnp.float32)       # Linear(C -> C//r)
    w2 = 0.1 * jax.random.normal(k2, (C, CR), dtype=jnp.float32)       # Linear(C//r -> C)
    wc = 0.1 * jax.random.normal(k3, (1, 1, 7, 7), dtype=jnp.float32)  # Conv2d(1,1,7)

    out = dual_attention(x, w1, w2, wc)
    out = jax.block_until_ready(out)

    ref = dual_attention_reference(x, w1, w2, wc)
    assert out.shape == (B, C, H, W)
    # The in-kernel matmuls (weighted channel mean + Toeplitz conv) run on the MXU at
    # default f32 precision (bf16 passes), so allow a slightly looser tolerance than
    # the previous pure-VPU implementation required.
    err = jnp.max(jnp.abs(out - ref))
    assert jnp.allclose(out, ref, atol=2e-3, rtol=2e-3), f"max abs err = {err}"

    print("KERNEL_OK")
</pallas_src>

<mosaic_0001>
module attributes {stable_mosaic.version = 11 : i64} {
  func.func @dual_attention_kernel(%arg0: i32, %arg1: memref<1x32x256xf32, #tpu.memory_space<vmem>>, %arg2: memref<4x32xf32, #tpu.memory_space<vmem>>, %arg3: memref<32x4xf32, #tpu.memory_space<vmem>>, %arg4: memref<256x256xf32, #tpu.memory_space<vmem>>, %arg5: memref<1x32x256xf32, #tpu.memory_space<vmem>>) attributes {dimension_semantics = [#tpu.dimension_semantics<parallel>], iteration_bounds = array<i64: 2>, scalar_prefetch = 0 : i64, scratch_operands = 0 : i64, tpu.core_type = #tpu.core_type<tc>, window_params = [{transform_indices = @transform_0, window_bounds = array<i64: 1, 32, 256>}, {pipeline_mode = #tpu.pipeline_mode<synchronous>, transform_indices = @transform_1, window_bounds = array<i64: 4, 32>}, {pipeline_mode = #tpu.pipeline_mode<synchronous>, transform_indices = @transform_2, window_bounds = array<i64: 32, 4>}, {pipeline_mode = #tpu.pipeline_mode<synchronous>, transform_indices = @transform_3, window_bounds = array<i64: 256, 256>}, {transform_indices = @transform_4, window_bounds = array<i64: 1, 32, 256>}]} {
    %c0 = arith.constant 0 : index
    %c0_0 = arith.constant 0 : index
    %c0_1 = arith.constant 0 : index
    %0 = vector.load %arg1[%c0, %c0_0, %c0_1] : memref<1x32x256xf32, #tpu.memory_space<vmem>>, vector<1x32x256xf32>
    %cst = arith.constant dense<0.000000e+00> : vector<1x32xf32>
    %1 = vector.multi_reduction <add>, %0, %cst [2] : vector<1x32x256xf32> to vector<1x32xf32>
    %cst_2 = arith.constant 2.560000e+02 : f32
    %2 = vector.broadcast %cst_2 : f32 to vector<1x32xf32>
    %3 = arith.divf %1, %2 : vector<1x32xf32>
    %c0_3 = arith.constant 0 : index
    %c0_4 = arith.constant 0 : index
    %4 = vector.load %arg2[%c0_3, %c0_4] : memref<4x32xf32, #tpu.memory_space<vmem>>, vector<4x32xf32>
    %c0_5 = arith.constant 0 : index
    %c0_6 = arith.constant 0 : index
    %5 = vector.load %arg3[%c0_5, %c0_6] : memref<32x4xf32, #tpu.memory_space<vmem>>, vector<32x4xf32>
    %6 = vector.shape_cast %3 : vector<1x32xf32> to vector<1x1x32xf32>
    %7 = vector.shape_cast %4 : vector<4x32xf32> to vector<1x4x32xf32>
    %8 = vector.broadcast %6 : vector<1x1x32xf32> to vector<1x4x32xf32>
    %9 = arith.mulf %8, %7 : vector<1x4x32xf32>
    %cst_7 = arith.constant dense<0.000000e+00> : vector<1x4xf32>
    %10 = vector.multi_reduction <add>, %9, %cst_7 [2] : vector<1x4x32xf32> to vector<1x4xf32>
    %cst_8 = arith.constant 0.000000e+00 : f32
    %11 = vector.broadcast %cst_8 : f32 to vector<1x4xf32>
    %12 = arith.maximumf %10, %11 : vector<1x4xf32>
    %13 = vector.shape_cast %12 : vector<1x4xf32> to vector<1x1x4xf32>
    %14 = vector.shape_cast %5 : vector<32x4xf32> to vector<1x32x4xf32>
    %15 = vector.broadcast %13 : vector<1x1x4xf32> to vector<1x32x4xf32>
    %16 = arith.mulf %15, %14 : vector<1x32x4xf32>
    %cst_9 = arith.constant dense<0.000000e+00> : vector<1x32xf32>
    %17 = vector.multi_reduction <add>, %16, %cst_9 [2] : vector<1x32x4xf32> to vector<1x32xf32>
    %18 = arith.negf %17 : vector<1x32xf32>
    %19 = math.exp %18 : vector<1x32xf32>
    %cst_10 = arith.constant 1.000000e+00 : f32
    %20 = vector.broadcast %cst_10 : f32 to vector<1x32xf32>
    %21 = arith.addf %20, %19 : vector<1x32xf32>
    %22 = arith.divf %20, %21 : vector<1x32xf32>
    %cst_11 = arith.constant 3.125000e-02 : f32
    %23 = vector.broadcast %cst_11 : f32 to vector<1x32xf32>
    %24 = arith.mulf %22, %23 : vector<1x32xf32>
    %25 = vector.shape_cast %24 : vector<1x32xf32> to vector<1x1x32xf32>
    "tpu.trace_start"() <{level = 10 : i32, message = "bmc,bcs->bms"}> : () -> ()
    %cst_12 = arith.constant dense<0.000000e+00> : vector<1x1x256xf32>
    %26 = tpu.matmul %25, %0, %cst_12 {dimension_numbers = #tpu.dot_dimension_numbers<[2], [1], [1], [2], [0, 0, 0, 1, 1, 2], [0], [0]>} : vector<1x1x32xf32>, vector<1x32x256xf32>, vector<1x1x256xf32> -> vector<1x1x256xf32>
    "tpu.trace_stop"() : () -> ()
    %27 = vector.shape_cast %26 : vector<1x1x256xf32> to vector<1x256xf32>
    %c0_13 = arith.constant 0 : index
    %c0_14 = arith.constant 0 : index
    %28 = vector.load %arg4[%c0_13, %c0_14] : memref<256x256xf32, #tpu.memory_space<vmem>>, vector<256x256xf32>
    %cst_15 = arith.constant dense<0.000000e+00> : vector<1x256xf32>
    %29 = tpu.matmul %27, %28, %cst_15 {dimension_numbers = #tpu.dot_dimension_numbers<[1], [0], [0], [1], [0, 0, 1, 1], [], []>} : vector<1x256xf32>, vector<256x256xf32>, vector<1x256xf32> -> vector<1x256xf32>
    %30 = arith.negf %29 : vector<1x256xf32>
    %31 = math.exp %30 : vector<1x256xf32>
    %cst_16 = arith.constant 1.000000e+00 : f32
    %32 = vector.broadcast %cst_16 : f32 to vector<1x256xf32>
    %33 = arith.addf %32, %31 : vector<1x256xf32>
    %34 = arith.divf %32, %33 : vector<1x256xf32>
    %35 = vector.shape_cast %22 : vector<1x32xf32> to vector<1x32x1xf32>
    %36 = vector.broadcast %35 : vector<1x32x1xf32> to vector<1x32x256xf32>
    %37 = arith.mulf %0, %36 : vector<1x32x256xf32>
    %38 = vector.shape_cast %34 : vector<1x256xf32> to vector<1x1x256xf32>
    %39 = vector.broadcast %38 : vector<1x1x256xf32> to vector<1x32x256xf32>
    %40 = arith.mulf %37, %39 : vector<1x32x256xf32>
    %c0_17 = arith.constant 0 : index
    %c0_18 = arith.constant 0 : index
    %c0_19 = arith.constant 0 : index
    %41 = vector.load %arg5[%c0_17, %c0_18, %c0_19] : memref<1x32x256xf32, #tpu.memory_space<vmem>>, vector<1x32x256xf32>
    tpu.vector_store %arg5[%c0_17, %c0_18, %c0_19], %40 {strides = array<i32>} : memref<1x32x256xf32, #tpu.memory_space<vmem>>, vector<1x32x256xf32>,
    return
  }
  func.func @transform_0(%arg0: i32) -> (i32, i32, i32) {
    %c0_i32 = arith.constant 0 : i32
    %c0_i32_0 = arith.constant 0 : i32
    %c0_i32_1 = arith.constant 0 : i32
    return %arg0, %c0_i32, %c0_i32_0 : i32, i32, i32
  }
  func.func @transform_1(%arg0: i32) -> (i32, i32) {
    %c0_i32 = arith.constant 0 : i32
    %c0_i32_0 = arith.constant 0 : i32
    %c0_i32_1 = arith.constant 0 : i32
    return %c0_i32, %c0_i32_0 : i32, i32
  }
  func.func @transform_2(%arg0: i32) -> (i32, i32) {
    %c0_i32 = arith.constant 0 : i32
    %c0_i32_0 = arith.constant 0 : i32
    %c0_i32_1 = arith.constant 0 : i32
    return %c0_i32, %c0_i32_0 : i32, i32
  }
  func.func @transform_3(%arg0: i32) -> (i32, i32) {
    %c0_i32 = arith.constant 0 : i32
    %c0_i32_0 = arith.constant 0 : i32
    %c0_i32_1 = arith.constant 0 : i32
    return %c0_i32, %c0_i32_0 : i32, i32
  }
  func.func @transform_4(%arg0: i32) -> (i32, i32, i32) {
    %c0_i32 = arith.constant 0 : i32
    %c0_i32_0 = arith.constant 0 : i32
    %c0_i32_1 = arith.constant 0 : i32
    return %arg0, %c0_i32, %c0_i32_0 : i32, i32, i32
  }
}

</mosaic_0001>

<bundles_post_ra>
// kernel: tpu_custom_call.1
= control target key start
LH: loop header
LB: loop body
LE: loop exit
PB: predicated region body
PF: predicated region fallthrough
CT: control target
= control target key end

     0   :  { %9 = vsyncpa [#allocation3], 0  ;;  %s2418_s0 = inlined_call_operand.hbm [shape: f32[2,32,256], index: 0, kind: input, shape index: {}]   ;;  %s2419_s1 = inlined_call_operand.vmem [shape: f32[4,32], index: 1, kind: input, shape index: {}]   ;;  %s2420_s2 = inlined_call_operand.vmem [shape: f32[32,4], index: 2, kind: input, shape index: {}]   ;;  %s2421_s3 = inlined_call_operand.hbm [shape: f32[256,256], index: 3, kind: input, shape index: {}]   ;;  %s2422_s4 = inlined_call_operand.hbm [shape: f32[2,32,256], index: 4, kind: output, shape index: {}]  }
   0x1   :  { %11 = vsyncpa [#allocation3 + $0x1], 0 }
   0x2   :  { %12 = vsyncpa [#allocation6], 0 }
   0x3   :  { %13 = vsyncpa [#allocation4], 0 }
   0x4   :  { %15 = vsyncpa [#allocation4 + $0x1], 0  ;;  %s1886_s15 = smov 0   ;;  %s1888_s16 = smov 0  }
   0x5   :  { %s1890_s17 = smov 0   ;;  %s1892_s18 = smov 0  }
   0x6 LB: > { %s1907_s19 = sadd.s32 4294967295, %s1850_s18   ;;  %s1528_s20 = sadd.s32 4294967294, %s1850_s18   ;;  %s1850_s18 = sphi %s1892_s18, %s2442_s18   ;;  %s1846_s17 = sphi %s1890_s17, %s2441_s17   ;;  %s1842_s16 = sphi %s1888_s16, %s2440_s16   ;;  %s1838_s15 = sphi %s1886_s15, %s2439_s15  }
   0x7   : > { %p41_p0 = scmp.ne.s32.totalorder %s1842_s16, %s1838_s15  ;;  %p2423_p1 = scmp.eq.s32.totalorder %s1907_s19, 0 }
   0x8   : > { %p134_p3 = scmp.eq.s32.totalorder %s1528_s20, 1  ;;  %p1529_p5 = scmp.ge.s32.totalorder %s1850_s18, 1 }
   0x9   : > { %p1916_p4 = por %p2423_p1, %p41_p0  ;;  %p141_p7 = scmp.lt.s32.totalorder %s1850_s18, 3 }
   0xa   : > { %p1921_p6 = por %p134_p3, %p41_p0  ;;  %s1852_s24 = smov [#allocation5]  }
   0xb   : > { %s2426_s21 = scalar_select %p1916_p4, 1, 0 }
   0xc   : > { %s2427_s22 = scalar_select %p1921_p6, 1, 0 }
   0xd   : > { %p1926_p8 = pnand %p1529_p5, %p141_p7  ;;  %s159_s25 = sshll.u32 %s1852_s24, 4  ;;  %s1930_s25 = int_to_ptr.vmem [resolvable:$true] %s159_s25 }
   0xe   : > { %s1942_s27 = sadd.s32 1, %s1850_s18   ;;  %s28_s28 = sadd.s32 1, %s1846_s17 }
   0xf   : > { %s2428_s23 = scalar_select %p1926_p8, 1, 0 }
  0x10   : > { %p1633_p9 = pneg %p1926_p8  ;;  %s25_s29 = ssub.s32 %s1850_s18, %s1942_s27 }
  0x11   : > { %s1722_s6 = scalar_lea.hbm %s2421_s3, 8192 }
  0x12   : > { %p1937_p11 = pnand %p1633_p9, %p2423_p1  ;;  %p1723_p12 = scmp.ne.s32.totalorder %s2421_s3, %s1722_s6 }
  0x13   : > { %p1729_p5 = scmp.lt.u32.totalorder %s1722_s6, %s2421_s3 }
  0x14   : > { %p1724_p13 = pneg %p1937_p11 }
  0x16   : > { %p1725_p0 = pnand %p1724_p13, %p1723_p12 }
  0x18   : > { %p1726_p3 = pneg %p1725_p0 }
  0x1a   : > { %p1731_p7 = pnand %p1729_p5, %p1726_p3 }
  0x1c   : > { %1734 = shalt.err (!%p1731_p7)
}
  0x1d   : > { %s1735_s11 = scalar_lea.vmem %s1930_s25, 8192  ;;  %p1743_p2 = scmp.lt.s32.totalorder %s1930_s25, %s1930_s25 }
  0x1e   : > { %p1736_p9 = scmp.ne.s32.totalorder %s1930_s25, %s1735_s11  ;;  %p1744_p6 = scmp.lt.s32.totalorder %s1735_s11, %s1735_s11 }
  0x20   : > { %p1738_p10 = pnand %p1736_p9, %p1724_p13  ;;  %p1745_p4 = por %p1744_p6, %p1743_p2 }
  0x22   : > { %p1739_p1 = pneg %p1738_p10 }
  0x24   : > { %p1746_p8 = pnand %p1745_p4, %p1739_p1 }
  0x26   : > { %1749 = shalt.err (!%p1746_p8)
}
  0x27   : > { %s1853_s12 = smov 256   ;;  %s1854_s13 = smov 16  }
  0x28   : > { %1636 = dma.hbm_to_vmem [thread:$0]  (!%p1937_p11), %s2421_s3, 8192, %s1930_s25, [#allocation6], %s1853_s12, %s1853_s12, %s1854_s13  }
  0x29   : > { %p26_p1 = scmp.eq.s32.totalorder %s25_s29, 0  ;;  %p35_p2 = scmp.ne.s32.totalorder %s1846_s17, %s1842_s16 }
  0x2a   : > { %p36_p4 = scmp.eq.s32.totalorder %s1850_s18, 0  ;;  %p1646_p6 = scmp.lt.s32.totalorder %s1850_s18, 2 }
  0x2b   : > { %s1976_s24 = scalar_select %p26_p1, %s1846_s17, %s28_s28  }
  0x2c   : > { %p37_p8 = por %p36_p4, %p35_p2  ;;  %p2430_p10 = scmp.eq.s32.totalorder %s1907_s19, 1 }
  0x2d   : > { %s173_s26 = sand.u32 1, %s1846_s17   ;;  %s1551_s5 = sshll.u32 %s1850_s18, 10 }
  0x2e   : > { %p1980_p12 = por %p2430_p10, %p35_p2  ;;  %s1532_s6 = sshll.u32 %s173_s26, 6 }
  0x2f   : > { %s1989_s9 = scalar_lea.hbm %s2418_s0, %s1551_s5  ;;  %s177_s25 = scalar_lea.vmem [#allocation2], %s1532_s6 }
  0x30   : > { %s184_s28 = sshll.u32 %s177_s25, 4  ;;  %p1991_p11 = pnand %p1646_p6, %p37_p8  ;;  %s1995_s28 = int_to_ptr.vmem [resolvable:$true] %s184_s28 }
  0x31   : > { %s1997_s10 = scalar_lea.sflag [#allocation3], %s173_s26  ;;  %s1750_s11 = scalar_lea.hbm %s1989_s9, 1024 }
  0x32   : > { %p1751_p13 = scmp.ne.s32.totalorder %s1989_s9, %s1750_s11  ;;  %p1752_p0 = pneg %p1991_p11 }
  0x33   : > { %s1755_s5 = scalar_lea.hbm %s2418_s0, 2048  ;;  %p1756_p7 = scmp.lt.u32.totalorder %s1989_s9, %s2418_s0 }
  0x34   : > { %p1753_p3 = pnand %p1752_p0, %p1751_p13  ;;  %p1757_p9 = scmp.lt.u32.totalorder %s1755_s5, %s1750_s11 }
  0x35   : > { %p1759_p2 = scmp.lt.u32.totalorder %s1750_s11, %s1989_s9 }
  0x36   : > { %p1754_p5 = pneg %p1753_p3  ;;  %p1758_p1 = por %p1757_p9, %p1756_p7 }
  0x38   : > { %p1760_p4 = por %p1759_p2, %p1758_p1 }
  0x3a   : > { %p1761_p6 = pnand %p1760_p4, %p1754_p5 }
  0x3c   : > { %1764 = shalt.err (!%p1761_p6)
}
  0x3d   : > { %s1765_s26 = scalar_lea.vmem %s1995_s28, 1024  ;;  %s1855_s8 = smov [#allocation2]  }
  0x3e   : > { %p1766_p8 = scmp.ne.s32.totalorder %s1995_s28, %s1765_s26  ;;  %s1770_s25 = sshll.u32 %s1855_s8, 4  ;;  %s1771_s25 = int_to_ptr.vmem [resolvable:$false] %s1770_s25 }
  0x3f   : > { %s1772_s14 = scalar_lea.vmem %s1771_s25, 2048  ;;  %p1773_p3 = scmp.lt.s32.totalorder %s1995_s28, %s1771_s25 }
  0x40   : > { %p1768_p10 = pnand %p1766_p8, %p1752_p0  ;;  %p1774_p7 = scmp.lt.s32.totalorder %s1772_s14, %s1765_s26 }
  0x42   : > { %p1769_p13 = pneg %p1768_p10  ;;  %p1775_p9 = por %p1774_p7, %p1773_p3 }
  0x44   : > { %p1776_p1 = pnand %p1775_p9, %p1769_p13 }
  0x46   : > { %1779 = shalt.err (!%p1776_p1)
}
  0x47   : > { %1640 = dma.hbm_to_vmem [thread:$0]  (!%p1991_p11), %s1989_s9, 1024, %s1995_s28, %s1997_s10, %s1853_s12, %s1853_s12, %s1854_s13  }
  0x48   : > { %p2433_p0 = scmp.ne.s32.totalorder %s2428_s23, 0 }
  0x49   : > { %s2031_s11 = sand.u32 (!%p2433_p0), 1, %s1842_s16   ;;  %p2434_p5 = scmp.ne.s32.totalorder (!%p2433_p0), %s2426_s21, 0 }
  0x4a   : > { %196 = sbr.rel (%p2433_p0) target bundleno = 1391 (0x56f), region = 36  ;;  %s1536_s20 = sshll.u32 (!%p2433_p0), %s2031_s11, 6 }
  0x4b   : > { %s199_s5 = scalar_lea.sflag (!%p2433_p0), [#allocation3], %s2031_s11  ;;  %s2037_s29 = scalar_lea.vmem (!%p2433_p0), [#allocation2], %s1536_s20 }
  0x51   : > { %1825 = dma.done.wait (%p2434_p5), %s199_s5, 1024  }
  0x52   : > { %1827 = vsyncadd (%p2434_p5), %s199_s5, 4294966272  ;;  %p2435_p11 = scmp.eq.s32.totalorder %s1907_s19, 0 }
  0x54   : > { %1829 = dma.done.wait (%p2435_p11), [#allocation6], 8192   ;;  %p2436_p2 = pmov %p2435_p11 }
  0x55   : > { %v2048_v0 = vld [vmem:[%s2037_s29 + $0x20] sm:$0xff]  ;;  %v2051_v1 = vld [vmem:[%s2037_s29 + $0x28] sm:$0xff]  ;;  %v2062_v5 = vld [vmem:[%s2037_s29 + $0x30] sm:$0xff]  ;;  %v262_v12 = vlaneseq  ;;  %v1856_v19 = vmov 0   ;;  %vm445_vm0 = vcmask 130112   ;;  %vm452_vm1 = vcmask 195712  }
  0x56   : > { %1831 = vsyncadd (%p2436_p2), [#allocation6], 4294959104  ;;  %v2054_v2 = vld [vmem:[%s2037_s29] sm:$0xff]  ;;  %v245_v3 = vadd.f32 %v2051_v1, %v2048_v0  ;;  %v2059_v4 = vld [vmem:[%s2037_s29 + $0x8] sm:$0xff]  ;;  %1689 = vset.pattern.permute.xlu1 %v1856_v19  ;;  %1688 = vset.pattern.permute.xlu0 %v1856_v19  ;;  %vm459_vm2 = vcmask 261312   ;;  %vm518_vm3 = vcmask 1041409  }
  0x57   : > { %v2065_v6 = vld [vmem:[%s2037_s29 + $0x38] sm:$0xff]  ;;  %v239_v7 = vadd.f32 %v2059_v4, %v2054_v2  ;;  %v2070_v8 = vld [vmem:[%s2037_s29 + $0x10] sm:$0xff]  ;;  %v2080_v13 = vshrl.u32 %v262_v12, 7  ;;  %v256_v15 = vld [vmem:[%s2419_s1] sm:$0xf]  ;;  %vm520_vm4 = vcmask 1042434  }
  0x58   : > { %v2073_v9 = vld [vmem:[%s2037_s29 + $0x18] sm:$0xff]  ;;  %246 = vadd.xlane.f32.xlu1 %v245_v3  ;;  %v248_v10 = vadd.f32 %v2065_v6, %v2062_v5  ;;  %v2104_v60 = vld [vmem:[%s2420_s2 + $0x8] sm:$0xff]  ;;  %vm522_vm5 = vcmask 1043459   ;;  %vm525_vm6 = vcmask 257024   ;;  %vm1081_vm7 = vcmask 1044484   ;;  %s1552_s8 = sshll.u32 %s1907_s19, 10 }
  0x59   : > { %240 = vadd.xlane.f32.xlu0 %v239_v7  ;;  %v242_v11 = vadd.f32 %v2073_v9, %v2070_v8  ;;  %v2083_v14 = vsub.s32 0, %v2080_v13  ;;  %v2090_v17 = vsub.s32 1, %v2080_v13  ;;  %v2094_v20 = vsub.s32 2, %v2080_v13  ;;  %v259_v7 = vld [vmem:[%s2420_s2 + $0x10] sm:$0xff]  ;;  %s2350_s25 = scalar_lea.vmem [#allocation7], %s1536_s20  ;;  %s2364_s5 = scalar_lea.hbm %s2422_s4, %s1552_s8 }
  0x5a   : > { %v2098_v22 = vsub.s32 3, %v2080_v13  ;;  %vm1083_vm8 = vcmask 1045509   ;;  %vm1085_vm9 = vcmask 1046534   ;;  %vm1087_vm10 = vcmask 1047559   ;;  %s1445_s14 = sshll.u32 %s2350_s25, 4  ;;  %s1858_s23 = smov [#allocation7]   ;;  %s2366_s14 = int_to_ptr.vmem [resolvable:$true] %s1445_s14 }
  0x5b   : > { %v265_v16 = vrot.slane %v256_v15, %v2083_v14  ;;  %v284_v18 = vrot.slane %v256_v15, %v2090_v17  ;;  %v303_v21 = vrot.slane %v256_v15, %v2094_v20  ;;  %vm1114_vm11 = vcmask 31744   ;;  %s1780_s21 = scalar_lea.vmem %s2366_s14, 1024  ;;  %s1784_s12 = sshll.u32 %s1858_s23, 4  ;;  %s1785_s12 = int_to_ptr.vmem [resolvable:$false] %s1784_s12 }
  0x5c   : > { %249 = vadd.xlane.f32.xlu1 %v248_v10  ;;  %v322_v23 = vrot.slane %v256_v15, %v2098_v22  ;;  %v614_v63 = vrot.slane %v2104_v60, %v2098_v22  ;;  %v670_v15 = vrot.slane %v259_v7, %v2098_v22  ;;  %vm1178_vm12 = vcmask 261120   ;;  %p1781_p4 = scmp.ne.s32.totalorder %s2366_s14, %s1780_s21  ;;  %s1786_s13 = scalar_lea.vmem %s1785_s12, 2048 }
  0x5d   : > { %243 = vadd.xlane.f32.xlu0 %v242_v11  ;;  %v257_v11 = vld [vmem:[%s2420_s2] sm:$0xff]  ;;  %p1787_p10 = scmp.lt.s32.totalorder %s2366_s14, %s1785_s12  ;;  %p1788_p13 = scmp.lt.s32.totalorder %s1786_s13, %s1780_s21 }
  0x5e   : > { %p1782_p6 = pnand %p1781_p4, %p1980_p12 }
  0x5f   : > { %p1789_p3 = por %p1788_p13, %p1787_p10 }
  0x60   : > { %p1783_p8 = pneg %p1782_p6 }
  0x62   : > { %p1790_p7 = pnand %p1789_p3, %p1783_p8 }
  0x6d   : > { %271 = vbcast.lane.b32.xlu1 %v265_v16, 264 }
  0x71   : > { %286 = vbcast.lane.b32.xlu1 %v284_v18, 256 }
  0x73   : > { %267 = vbcast.lane.b32.xlu0 %v265_v16, 256 }
  0x75   : > { %290 = vbcast.lane.b32.xlu1 %v284_v18, 264 }
  0x77   : > { %275 = vbcast.lane.b32.xlu0 %v265_v16, 272 }
  0x79   : > { %294 = vbcast.lane.b32.xlu1 %v284_v18, 272 }
  0x7b   : > { %305 = vbcast.lane.b32.xlu0 %v303_v21, 256 }
  0x7d   : > { %309 = vbcast.lane.b32.xlu1 %v303_v21, 264 }
  0x7f   : > { %279 = vbcast.lane.b32.xlu0 %v265_v16, 280  ;;  %v2116_v16 = vsub.s32 5, %v2080_v13 }
  0x81   : > { %298 = vbcast.lane.b32.xlu1 %v284_v18, 280  ;;  %v537_v18 = vrot.slane %v257_v11, %v2083_v14  ;;  %v572_v19 = vrot.slane %v257_v11, %v2116_v16 }
  0x83   : > { %313 = vbcast.lane.b32.xlu0 %v303_v21, 272 }
  0x85   : > { %324 = vbcast.lane.b32.xlu1 %v322_v23, 256 }
  0x87   : > { %328 = vbcast.lane.b32.xlu0 %v322_v23, 264 }
  0x89   : > { %317 = vbcast.lane.b32.xlu1 %v303_v21, 280  ;;  %v564_v21 = vsub.s32 4, %v2080_v13 }
  0x8b   : > { %332 = vbcast.lane.b32.xlu0 %v322_v23, 272 }
  0x8d   : > { %336 = vbcast.lane.b32.xlu1 %v322_v23, 280  ;;  %v544_v23 = vrot.slane %v257_v11, %v2090_v17 }
  0xe5   : > { %v247_v24 = vpop.xlane.xlu1 %246 }
  0xe6   : > { %v241_v25 = vpop.xlane.xlu0 %240  ;;  %v254_v37 = vmul.f32 0.00390625, %v247_v24  ;;  %v677_v24 = vrot.slane %v259_v7, %v564_v21 }
  0xe7   : > { %v252_v29 = vmul.f32 0.00390625, %v241_v25  ;;  %v578_v25 = vsub.s32 6, %v2080_v13 }
  0xe9   : > { %v250_v26 = vpop.xlane.xlu1 %249 }
  0xea   : > { %v244_v27 = vpop.xlane.xlu0 %243  ;;  %v255_v46 = vmul.f32 0.00390625, %v250_v26  ;;  %v593_v26 = vrot.slane %v2104_v60, %v2083_v14 }
  0xeb   : > { %v253_v28 = vmul.f32 0.00390625, %v244_v27  ;;  %v579_v27 = vrot.slane %v257_v11, %v578_v25 }
  0xed   : > { %v272_v30 = vpop.permute.xlu1 %271 }
  0xee   : > { %v355_v31 = vmul.f32 %v272_v30, %v253_v28  ;;  %v268_v32 = vpop.permute.xlu0 %267  ;;  %v585_v30 = vsub.s32 7, %v2080_v13 }
  0xef   : > { %v354_v33 = vmul.f32 %v268_v32, %v252_v29 }
  0xf0   : > { %390 = vperm.xlu1 %1689, %v355_v31   ;;  %v551_v31 = vrot.slane %v257_v11, %v2094_v20  ;;  %v586_v32 = vrot.slane %v257_v11, %v585_v30 }
  0xf1   : > { %387 = vperm.xlu0 %1688, %v354_v33   ;;  %v287_v34 = vpop.permute.xlu1 %286  ;;  %v607_v33 = vrot.slane %v2104_v60, %v2094_v20 }
  0xf2   : > { %v358_v35 = vmul.f32 %v287_v34, %v252_v29  ;;  %v276_v36 = vpop.permute.xlu0 %275  ;;  %v691_v34 = vrot.slane %v259_v7, %v578_v25 }
  0xf3   : > { %v356_v39 = vmul.f32 %v276_v36, %v254_v37  ;;  %v698_v36 = vrot.slane %v259_v7, %v585_v30 }
  0xf4   : > { %399 = vperm.xlu1 %1689, %v358_v35   ;;  %v649_v35 = vrot.slane %v259_v7, %v2083_v14 }
  0xf5   : > { %v291_v38 = vpop.permute.xlu1 %290 }
  0xf6   : > { %v359_v40 = vmul.f32 %v291_v38, %v253_v28  ;;  %v306_v41 = vpop.permute.xlu0 %305  ;;  %v260_v38 = vld [vmem:[%s2420_s2 + $0x18] sm:$0xff] }
  0xf7   : > { %v362_v43 = vmul.f32 %v306_v41, %v252_v29  ;;  %v663_v41 = vrot.slane %v259_v7, %v2094_v20 }
  0xf8   : > { %402 = vperm.xlu0 %1688, %v359_v40   ;;  %393 = vperm.xlu1 %1689, %v356_v39   ;;  %v754_v39 = vrot.slane %v260_v38, %v585_v30  ;;  %v558_v40 = vrot.slane %v257_v11, %v2098_v22 }
  0xf9   : > { %v295_v42 = vpop.permute.xlu1 %294 }
  0xfa   : > { %v360_v44 = vmul.f32 %v295_v42, %v254_v37  ;;  %v280_v45 = vpop.permute.xlu0 %279  ;;  %v705_v42 = vrot.slane %v260_v38, %v2083_v14 }
  0xfb   : > { %v357_v48 = vmul.f32 %v280_v45, %v255_v46  ;;  %v621_v45 = vrot.slane %v2104_v60, %v564_v21 }
  0xfc   : > { %405 = vperm.xlu0 %1688, %v360_v44   ;;  %411 = vperm.xlu1 %1689, %v362_v43   ;;  %v712_v43 = vrot.slane %v260_v38, %v2090_v17  ;;  %v565_v44 = vrot.slane %v257_v11, %v564_v21 }
  0xfd   : > { %v310_v47 = vpop.permute.xlu1 %309 }
  0xfe   : > { %v363_v49 = vmul.f32 %v310_v47, %v253_v28  ;;  %v314_v50 = vpop.permute.xlu0 %313  ;;  %v628_v47 = vrot.slane %v2104_v60, %v2116_v16 }
  0xff   : > { %v364_v52 = vmul.f32 %v314_v50, %v254_v37  ;;  %v642_v50 = vrot.slane %v2104_v60, %v585_v30 }
 0x100   : > { %414 = vperm.xlu0 %1688, %v363_v49   ;;  %396 = vperm.xlu1 %1689, %v357_v48   ;;  %v726_v48 = vrot.slane %v260_v38, %v2098_v22  ;;  %v635_v49 = vrot.slane %v2104_v60, %v578_v25 }
 0x101   : > { %v299_v51 = vpop.permute.xlu1 %298 }
 0x102   : > { %v361_v53 = vmul.f32 %v299_v51, %v255_v46  ;;  %v329_v54 = vpop.permute.xlu0 %328  ;;  %v740_v51 = vrot.slane %v260_v38, %v2116_v16 }
 0x103   : > { %v367_v56 = vmul.f32 %v329_v54, %v253_v28  ;;  %v600_v28 = vrot.slane %v2104_v60, %v2090_v17 }
 0x104   : > { %408 = vperm.xlu0 %1688, %v361_v53   ;;  %417 = vperm.xlu1 %1689, %v364_v52  }
 0x105   : > { %v325_v55 = vpop.permute.xlu1 %324 }
 0x106   : > { %v366_v57 = vmul.f32 %v325_v55, %v252_v29  ;;  %v333_v58 = vpop.permute.xlu0 %332  ;;  %v684_v29 = vrot.slane %v259_v7, %v2116_v16 }
 0x107   : > { %v368_v61 = vmul.f32 %v333_v58, %v254_v37  ;;  %v656_v37 = vrot.slane %v259_v7, %v2090_v17  ;;  %v733_v17 = vrot.slane %v260_v38, %v564_v21  ;;  %v435_v58 = vand.u32 127, %v262_v12 }
 0x108   : > { %423 = vperm.xlu0 %1688, %v366_v57   ;;  %426 = vperm.xlu1 %1689, %v367_v56  }
 0x109   : > { %v318_v59 = vpop.permute.xlu1 %317  ;;  %v454_v7 = vadd.s32 4294967272, %v435_v58  ;;  %v2154_v11 = vsub.s32 %v435_v58, %v2080_v13 }
 0x10a   : > { %v365_v62 = vmul.f32 %v318_v59, %v255_v46 }
 0x10c   : > { %420 = vperm.xlu0 %1688, %v365_v62   ;;  %429 = vperm.xlu1 %1689, %v368_v61   ;;  %v440_v62 = vadd.s32 4294967288, %v435_v58 }
 0x10d   : > { %v337_v3 = vpop.permute.xlu1 %336 }
 0x10e   : > { %v369_v10 = vmul.f32 %v337_v3, %v255_v46  ;;  %v719_v46 = vrot.slane %v260_v38, %v2094_v20  ;;  %v747_v20 = vrot.slane %v260_v38, %v578_v25 }
 0x110   : > { %432 = vperm.xlu0 %1688, %v369_v10   ;;  %616 = vbcast.lane.b32.xlu1 %v614_v63, 256  ;;  %v447_v63 = vadd.s32 4294967280, %v435_v58  ;;  %v2151_v10 = vsub.s32 %v440_v62, %v2080_v13 }
 0x114   : > { %672 = vbcast.lane.b32.xlu1 %v670_v15, 256  ;;  %539 = vbcast.lane.b32.xlu0 %v537_v18, 256  ;;  %v2157_v15 = vsub.s32 %v447_v63, %v2080_v13 }
 0x118   : > { %574 = vbcast.lane.b32.xlu1 %v572_v19, 256  ;;  %546 = vbcast.lane.b32.xlu0 %v544_v23, 256  ;;  %v2161_v19 = vsub.s32 %v454_v7, %v2080_v13 }
 0x11c   : > { %679 = vbcast.lane.b32.xlu1 %v677_v24, 256  ;;  %595 = vbcast.lane.b32.xlu0 %v593_v26, 256 }
 0x120   : > { %581 = vbcast.lane.b32.xlu1 %v579_v27, 256  ;;  %602 = vbcast.lane.b32.xlu0 %v600_v28, 256 }
 0x124   : > { %686 = vbcast.lane.b32.xlu1 %v684_v29, 256  ;;  %553 = vbcast.lane.b32.xlu0 %v551_v31, 256 }
 0x128   : > { %588 = vbcast.lane.b32.xlu1 %v586_v32, 256  ;;  %609 = vbcast.lane.b32.xlu0 %v607_v33, 256 }
 0x12c   : > { %693 = vbcast.lane.b32.xlu1 %v691_v34, 256  ;;  %651 = vbcast.lane.b32.xlu0 %v649_v35, 256 }
 0x130   : > { %700 = vbcast.lane.b32.xlu1 %v698_v36, 256  ;;  %658 = vbcast.lane.b32.xlu0 %v656_v37, 256 }
 0x134   : > { %756 = vbcast.lane.b32.xlu1 %v754_v39, 256  ;;  %560 = vbcast.lane.b32.xlu0 %v558_v40, 256 }
 0x138   : > { %665 = vbcast.lane.b32.xlu0 %v663_v41, 256 }
 0x13c   : > { %707 = vbcast.lane.b32.xlu0 %v705_v42, 256 }
 0x140   : > { %714 = vbcast.lane.b32.xlu0 %v712_v43, 256 }
 0x144   : > { %567 = vbcast.lane.b32.xlu0 %v565_v44, 256 }
 0x148   : > { %623 = vbcast.lane.b32.xlu0 %v621_v45, 256 }
 0x14c   : > { %721 = vbcast.lane.b32.xlu0 %v719_v46, 256 }
 0x150   : > { %630 = vbcast.lane.b32.xlu0 %v628_v47, 256 }
 0x154   : > { %728 = vbcast.lane.b32.xlu0 %v726_v48, 256 }
 0x158   : > { %637 = vbcast.lane.b32.xlu0 %v635_v49, 256 }
 0x15c   : > { %735 = vbcast.lane.b32.xlu0 %v733_v17, 256 }
 0x160   : > { %644 = vbcast.lane.b32.xlu0 %v642_v50, 256 }
 0x164   : > { %742 = vbcast.lane.b32.xlu0 %v740_v51, 256 }
 0x168   : > { %749 = vbcast.lane.b32.xlu0 %v747_v20, 256 }
 0x16f   : > { %v391_v52 = vpop.permute.xlu1 %390 }
 0x170   : > { %v388_v53 = vpop.permute.xlu0 %387  ;;  %v444_v25 = vrot.slane %v391_v52, %v2151_v10 }
 0x171   : > { %v439_v26 = vrot.slane %v388_v53, %v2154_v11 }
 0x173   : > { %v400_v54 = vpop.permute.xlu1 %399  ;;  %v446_v40 = vsel %vm445_vm0, %v444_v25, %v439_v26 }
 0x174   : > { %v464_v21 = vrot.slane %v400_v54, %v2154_v11 }
 0x177   : > { %v394_v55 = vpop.permute.xlu1 %393  ;;  %v403_v56 = vpop.permute.xlu0 %402 }
 0x178   : > { %v468_v16 = vrot.slane %v403_v56, %v2151_v10  ;;  %v451_v29 = vrot.slane %v394_v55, %v2157_v15 }
 0x17a   : > { %v469_v13 = vsel %vm445_vm0, %v468_v16, %v464_v21  ;;  %v453_v43 = vsel %vm452_vm1, %v451_v29, %v446_v40 }
 0x17b   : > { %v412_v22 = vpop.permute.xlu1 %411  ;;  %v406_v57 = vpop.permute.xlu0 %405 }
 0x17c   : > { %v473_v23 = vrot.slane %v406_v57, %v2157_v15  ;;  %v483_v30 = vrot.slane %v412_v22, %v2154_v11 }
 0x17e   : > { %v474_v37 = vsel %vm452_vm1, %v473_v23, %v469_v13 }
 0x17f   : > { %v397_v59 = vpop.permute.xlu1 %396  ;;  %v415_v61 = vpop.permute.xlu0 %414 }
 0x180   : > { %v487_v24 = vrot.slane %v415_v61, %v2151_v10  ;;  %v458_v33 = vrot.slane %v397_v59, %v2161_v19 }
 0x182   : > { %v488_v38 = vsel %vm445_vm0, %v487_v24, %v483_v30  ;;  %v460_v46 = vsel %vm459_vm2, %v458_v33, %v453_v43 }
 0x183   : > { %v418_v60 = vpop.permute.xlu1 %417  ;;  %v409_v3 = vpop.permute.xlu0 %408 }
 0x184   : > { %v492_v27 = vrot.slane %v418_v60, %v2157_v15  ;;  %v478_v28 = vrot.slane %v409_v3, %v2161_v19 }
 0x186   : > { %v493_v41 = vsel %vm452_vm1, %v492_v27, %v488_v38  ;;  %v479_v42 = vsel %vm459_vm2, %v478_v28, %v474_v37 }
 0x187   : > { %v427_v18 = vpop.permute.xlu1 %426  ;;  %v424_v12 = vpop.permute.xlu0 %423  ;;  %v519_v17 = vsel %vm518_vm3, %v479_v42, %v460_v46 }
 0x188   : > { %v506_v34 = vrot.slane %v427_v18, %v2151_v10  ;;  %v502_v35 = vrot.slane %v424_v12, %v2154_v11 }
 0x18a   : > { %v507_v47 = vsel %vm445_vm0, %v506_v34, %v502_v35 }
 0x18b   : > { %v430_v31 = vpop.permute.xlu1 %429  ;;  %v421_v32 = vpop.permute.xlu0 %420 }
 0x18c   : > { %v497_v36 = vrot.slane %v421_v32, %v2161_v19  ;;  %v511_v39 = vrot.slane %v430_v31, %v2157_v15 }
 0x18e   : > { %v498_v44 = vsel %vm459_vm2, %v497_v36, %v493_v41  ;;  %v512_v49 = vsel %vm452_vm1, %v511_v39, %v507_v47 }
 0x18f   : > { %v433_v45 = vpop.permute.xlu0 %432  ;;  %v521_v51 = vsel %vm520_vm4, %v498_v44, %v519_v17  ;;  %v617_v55 = vpop.permute.xlu1 %616 }
 0x190   : > { %v516_v48 = vrot.slane %v433_v45, %v2161_v19 }
 0x192   : > { %v517_v50 = vsel %vm459_vm2, %v516_v48, %v512_v49 }
 0x193   : > { %v523_v20 = vsel %vm522_vm5, %v517_v50, %v521_v51  ;;  %v540_v53 = vpop.permute.xlu0 %539  ;;  %v673_v22 = vpop.permute.xlu1 %672 }
 0x194   : > { %v526_v52 = vsel %vm525_vm6, %v523_v20, 0.0 }
 0x195   : > { %527 = vadd.xlane.f32.xlu1 %v526_v52 }
 0x197   : > { %v547_v54 = vpop.permute.xlu0 %546  ;;  %v575_v58 = vpop.permute.xlu1 %574 }
 0x19b   : > { %v596_v56 = vpop.permute.xlu0 %595  ;;  %v680_v61 = vpop.permute.xlu1 %679 }
 0x19f   : > { %v603_v57 = vpop.permute.xlu0 %602  ;;  %v582_v63 = vpop.permute.xlu1 %581 }
 0x1a3   : > { %v554_v59 = vpop.permute.xlu0 %553  ;;  %v2193_v3 = vpop.permute.xlu1 %686 }
 0x1a7   : > { %v610_v62 = vpop.permute.xlu0 %609  ;;  %v2195_v16 = vpop.permute.xlu1 %588 }
 0x1ab   : > { %v652_v60 = vpop.permute.xlu0 %651  ;;  %v2197_v12 = vpop.permute.xlu1 %693 }
 0x1af   : > { %v659_v7 = vpop.permute.xlu0 %658  ;;  %v2199_v23 = vpop.permute.xlu1 %700 }
 0x1b3   : > { %v561_v18 = vpop.permute.xlu0 %560  ;;  %v2201_v25 = vpop.permute.xlu1 %756 }
 0x1b7   : > { %v666_v21 = vpop.permute.xlu0 %665 }
 0x1bb   : > { %v708_v24 = vpop.permute.xlu0 %707 }
 0x1bf   : > { %v715_v26 = vpop.permute.xlu0 %714 }
 0x1c3   : > { %v568_v30 = vpop.permute.xlu0 %567 }
 0x1c7   : > { %v624_v34 = vpop.permute.xlu0 %623 }
 0x1cb   : > { %v722_v38 = vpop.permute.xlu0 %721 }
 0x1cf   : > { %v631_v42 = vpop.permute.xlu0 %630 }
 0x1d3   : > { %v729_v46 = vpop.permute.xlu0 %728 }
 0x1d7   : > { %v638_v17 = vpop.permute.xlu0 %637 }
 0x1db   : > { %v736_v52 = vpop.permute.xlu0 %735 }
 0x222   : > { %v528_v27 = vpop.xlane.xlu1 %527 }
 0x223   : > { %v2203_v28 = vmax.f32 %v528_v27, 0.0 }
 0x225   : > { %v790_v29 = vmul.f32 %v540_v53, %v2203_v28  ;;  %v791_v13 = vmul.f32 %v547_v54, %v2203_v28  ;;  %v798_v31 = vmul.f32 %v596_v56, %v2203_v28  ;;  %v799_v32 = vmul.f32 %v603_v57, %v2203_v28  ;;  %v645_v56 = vpop.permute.xlu0 %644 }
 0x226   : > { %v792_v33 = vmul.f32 %v554_v59, %v2203_v28  ;;  %v800_v35 = vmul.f32 %v610_v62, %v2203_v28  ;;  %v806_v36 = vmul.f32 %v652_v60, %v2203_v28  ;;  %v807_v37 = vmul.f32 %v659_v7, %v2203_v28 }
 0x227   : > { %855 = vperm.xlu0 %1688, %v790_v29   ;;  %858 = vperm.xlu1 %1689, %v791_v13   ;;  %v793_v39 = vmul.f32 %v561_v18, %v2203_v28  ;;  %v801_v40 = vmul.f32 %v617_v55, %v2203_v28  ;;  %v808_v41 = vmul.f32 %v666_v21, %v2203_v28 }
 0x228   : > { %v814_v43 = vmul.f32 %v708_v24, %v2203_v28  ;;  %v815_v44 = vmul.f32 %v715_v26, %v2203_v28  ;;  %v794_v45 = vmul.f32 %v568_v30, %v2203_v28  ;;  %v802_v47 = vmul.f32 %v624_v34, %v2203_v28 }
 0x229   : > { %v809_v48 = vmul.f32 %v673_v22, %v2203_v28  ;;  %v816_v49 = vmul.f32 %v722_v38, %v2203_v28  ;;  %v795_v50 = vmul.f32 %v575_v58, %v2203_v28  ;;  %v803_v51 = vmul.f32 %v631_v42, %v2203_v28  ;;  %v743_v59 = vpop.permute.xlu0 %742 }
 0x22a   : > { %v810_v20 = vmul.f32 %v680_v61, %v2203_v28  ;;  %v817_v53 = vmul.f32 %v729_v46, %v2203_v28  ;;  %v796_v54 = vmul.f32 %v582_v63, %v2203_v28  ;;  %v804_v55 = vmul.f32 %v638_v17, %v2203_v28 }
 0x22b   : > { %879 = vperm.xlu0 %1688, %v798_v31   ;;  %882 = vperm.xlu1 %1689, %v799_v32   ;;  %v811_v22 = vmul.f32 %v2193_v3, %v2203_v28  ;;  %v818_v57 = vmul.f32 %v736_v52, %v2203_v28  ;;  %v797_v58 = vmul.f32 %v2195_v16, %v2203_v28 }
 0x22c   : > { %v805_v61 = vmul.f32 %v645_v56, %v2203_v28  ;;  %v812_v62 = vmul.f32 %v2197_v12, %v2203_v28  ;;  %v819_v63 = vmul.f32 %v743_v59, %v2203_v28  ;;  %v813_v60 = vmul.f32 %v2199_v23, %v2203_v28 }
 0x22d   : > { %v750_v3 = vpop.permute.xlu0 %749  ;;  %v821_v16 = vmul.f32 %v2201_v25, %v2203_v28 }
 0x22e   : > { %v820_v7 = vmul.f32 %v750_v3, %v2203_v28 }
 0x22f   : > { %861 = vperm.xlu0 %1688, %v792_v33   ;;  %885 = vperm.xlu1 %1689, %v800_v35  }
 0x233   : > { %903 = vperm.xlu0 %1688, %v806_v36   ;;  %906 = vperm.xlu1 %1689, %v807_v37  }
 0x237   : > { %864 = vperm.xlu0 %1688, %v793_v39   ;;  %888 = vperm.xlu1 %1689, %v801_v40  }
 0x23b   : > { %909 = vperm.xlu0 %1688, %v808_v41   ;;  %927 = vperm.xlu1 %1689, %v814_v43  }
 0x23f   : > { %930 = vperm.xlu0 %1688, %v815_v44   ;;  %867 = vperm.xlu1 %1689, %v794_v45  }
 0x243   : > { %891 = vperm.xlu0 %1688, %v802_v47   ;;  %912 = vperm.xlu1 %1689, %v809_v48  }
 0x247   : > { %933 = vperm.xlu0 %1688, %v816_v49   ;;  %870 = vperm.xlu1 %1689, %v795_v50  }
 0x24b   : > { %894 = vperm.xlu0 %1688, %v803_v51   ;;  %915 = vperm.xlu1 %1689, %v810_v20  }
 0x24f   : > { %936 = vperm.xlu0 %1688, %v817_v53   ;;  %873 = vperm.xlu1 %1689, %v796_v54  }
 0x253   : > { %897 = vperm.xlu0 %1688, %v804_v55   ;;  %918 = vperm.xlu1 %1689, %v811_v22  }
 0x257   : > { %939 = vperm.xlu0 %1688, %v818_v57   ;;  %876 = vperm.xlu1 %1689, %v797_v58  }
 0x25b   : > { %900 = vperm.xlu0 %1688, %v805_v61   ;;  %921 = vperm.xlu1 %1689, %v812_v62  }
 0x25f   : > { %942 = vperm.xlu0 %1688, %v819_v63   ;;  %924 = vperm.xlu1 %1689, %v813_v60  }
 0x263   : > { %945 = vperm.xlu0 %1688, %v820_v7   ;;  %948 = vperm.xlu1 %1689, %v821_v16  }
 0x2a6   : > { %v856_v18 = vpop.permute.xlu0 %855  ;;  %v859_v21 = vpop.permute.xlu1 %858 }
 0x2a7   : > { %v957_v41 = vrot.slane %v859_v21, %v2154_v11  ;;  %v953_v42 = vrot.slane %v856_v18, %v2154_v11 }
 0x2a9   : > { %v1078_v50 = vsel %vm518_vm3, %v957_v41, %v953_v42 }
 0x2aa   : > { %v880_v12 = vpop.permute.xlu0 %879  ;;  %v883_v24 = vpop.permute.xlu1 %882 }
 0x2ab   : > { %v989_v44 = vrot.slane %v883_v24, %v2154_v11  ;;  %v985_v45 = vrot.slane %v880_v12, %v2154_v11 }
 0x2ad   : > { %v1089_v54 = vsel %vm518_vm3, %v989_v44, %v985_v45 }
 0x2ae   : > { %v862_v26 = vpop.permute.xlu0 %861  ;;  %v886_v27 = vpop.permute.xlu1 %885 }
 0x2af   : > { %v961_v43 = vrot.slane %v862_v26, %v2154_v11  ;;  %v993_v48 = vrot.slane %v886_v27, %v2154_v11 }
 0x2b1   : > { %v1079_v20 = vsel %vm520_vm4, %v961_v43, %v1078_v50  ;;  %v1090_v57 = vsel %vm520_vm4, %v993_v48, %v1089_v54 }
 0x2b2   : > { %v2242_v29 = vpop.permute.xlu0 %903  ;;  %v907_v13 = vpop.permute.xlu1 %906 }
 0x2b3   : > { %v1017_v58 = vrot.slane %v2242_v29, %v2154_v11  ;;  %v1021_v63 = vrot.slane %v907_v13, %v2154_v11 }
 0x2b6   : > { %v865_v23 = vpop.permute.xlu0 %864  ;;  %v889_v30 = vpop.permute.xlu1 %888 }
 0x2b7   : > { %v965_v46 = vrot.slane %v865_v23, %v2154_v11  ;;  %v997_v52 = vrot.slane %v889_v30, %v2154_v11 }
 0x2b9   : > { %v1080_v55 = vsel %vm522_vm5, %v965_v46, %v1079_v20  ;;  %v1091_v16 = vsel %vm522_vm5, %v997_v52, %v1090_v57 }
 0x2ba   : > { %v2244_v31 = vpop.permute.xlu0 %909  ;;  %v2246_v32 = vpop.permute.xlu1 %927 }
 0x2bb   : > { %v1025_v18 = vrot.slane %v2244_v31, %v2154_v11  ;;  %v1049_v42 = vrot.slane %v2246_v32, %v2154_v11 }
 0x2be   : > { %v2248_v33 = vpop.permute.xlu0 %930  ;;  %v868_v25 = vpop.permute.xlu1 %867 }
 0x2bf   : > { %v969_v49 = vrot.slane %v868_v25, %v2154_v11  ;;  %v1096_v25 = vsel %vm518_vm3, %v1021_v63, %v1017_v58  ;;  %v1555_v63 = vpack.c.bf16 %v2070_v8, %v2054_v2 }
 0x2c1   : > { %v1082_v59 = vsel %vm1081_vm7, %v969_v49, %v1080_v55 }
 0x2c2   : > { %v892_v28 = vpop.permute.xlu0 %891  ;;  %v2250_v34 = vpop.permute.xlu1 %912 }
 0x2c3   : > { %v1001_v56 = vrot.slane %v892_v28, %v2154_v11  ;;  %v1029_v12 = vrot.slane %v2250_v34, %v2154_v11  ;;  %v1053_v28 = vrot.slane %v2248_v33, %v2154_v11 }
 0x2c5   : > { %v1092_v24 = vsel %vm1081_vm7, %v1001_v56, %v1091_v16  ;;  %v1103_v48 = vsel %vm518_vm3, %v1053_v28, %v1049_v42  ;;  %v1253_v16 = vld [vmem:[#allocation5 + $0x8] sm:$0xff]  ;;  %v1264_v28 = vld [vmem:[#allocation5 + $0x60] sm:$0xff]  ;;  %v1270_v42 = vld [vmem:[#allocation5 + $0x90] sm:$0xff] }
 0x2c6   : > { %v2252_v35 = vpop.permute.xlu0 %933  ;;  %v871_v36 = vpop.permute.xlu1 %870 }
 0x2c7   : > { %v973_v51 = vrot.slane %v871_v36, %v2154_v11 }
 0x2c9   : > { %v1084_v60 = vsel %vm1083_vm8, %v973_v51, %v1082_v59 }
 0x2ca   : > { %v895_v37 = vpop.permute.xlu0 %894  ;;  %v2254_v38 = vpop.permute.xlu1 %915 }
 0x2cb   : > { %v1005_v61 = vrot.slane %v895_v37, %v2154_v11  ;;  %v1033_v29 = vrot.slane %v2254_v38, %v2154_v11  ;;  %v1097_v37 = vsel %vm520_vm4, %v1025_v18, %v1096_v25  ;;  %v1057_v38 = vrot.slane %v2252_v35, %v2154_v11  ;;  %v1255_v18 = vld [vmem:[#allocation5 + $0x18] sm:$0xff] }
 0x2cc   : > { %v1098_v43 = vsel %vm522_vm5, %v1029_v12, %v1097_v37  ;;  %v1561_v12 = vpack.c.bf16 %v1255_v18, %v1253_v16  ;;  %v1271_v37 = vld [vmem:[#allocation5 + $0x98] sm:$0xff]  ;;  %v1293_v16 = vld [vmem:[#allocation5 + $0x148] sm:$0xff] }
 0x2cd   : > { %v1093_v13 = vsel %vm1083_vm8, %v1005_v61, %v1092_v24  ;;  %v1099_v46 = vsel %vm1081_vm7, %v1033_v29, %v1098_v43  ;;  %v1104_v50 = vsel %vm520_vm4, %v1057_v38, %v1103_v48  ;;  %v1259_v24 = vld [vmem:[#allocation5 + $0x38] sm:$0xff]  ;;  %v1273_v43 = vld [vmem:[#allocation5 + $0xa8] sm:$0xff] }
 0x2ce   : > { %v2256_v39 = vpop.permute.xlu0 %936  ;;  %v874_v40 = vpop.permute.xlu1 %873  ;;  %1562 = vmatprep.subr.bf16.mxu1 %v1561_v12  ;;  %v1279_v48 = vld [vmem:[#allocation5 + $0xd8] sm:$0xff] }
 0x2cf   : > { %v977_v53 = vrot.slane %v874_v40, %v2154_v11  ;;  %v1061_v33 = vrot.slane %v2256_v39, %v2154_v11  ;;  %v1295_v18 = vld [vmem:[#allocation5 + $0x158] sm:$0xff] }
 0x2d0   : > { %v1601_v12 = vpack.c.bf16 %v1295_v18, %v1293_v16 }
 0x2d1   : > { %v1086_v21 = vsel %vm1085_vm9, %v977_v53, %v1084_v60  ;;  %v1105_v51 = vsel %vm522_vm5, %v1061_v33, %v1104_v50  ;;  %v1557_v60 = vpack.c.bf16 %v2065_v6, %v2051_v1  ;;  %v1258_v1 = vld [vmem:[#allocation5 + $0x30] sm:$0xff]  ;;  %v1261_v6 = vld [vmem:[#allocation5 + $0x48] sm:$0xff]  ;;  %v1275_v33 = vld [vmem:[#allocation5 + $0xb8] sm:$0xff] }
 0x2d2   : > { %v898_v47 = vpop.permute.xlu0 %897  ;;  %v919_v17 = vpop.permute.xlu1 %918  ;;  %v1278_v50 = vld [vmem:[#allocation5 + $0xd0] sm:$0xff] }
 0x2d3   : > { %v1009_v3 = vrot.slane %v898_v47, %v2154_v11  ;;  %v1037_v34 = vrot.slane %v919_v17, %v2154_v11 }
 0x2d5   : > { %v1094_v36 = vsel %vm1085_vm9, %v1009_v3, %v1093_v13  ;;  %v1100_v49 = vsel %vm1083_vm8, %v1037_v34, %v1099_v46  ;;  %v1857_v3 = vmov 0.0   ;;  %v1262_v13 = vld [vmem:[#allocation5 + $0x50] sm:$0xff]  ;;  %v1272_v46 = vld [vmem:[#allocation5 + $0xa0] sm:$0xff] }
 0x2d6   : > { %v940_v22 = vpop.permute.xlu0 %939  ;;  %v877_v62 = vpop.permute.xlu1 %876  ;;  %1245 = vmatprep.mubr.f32.mxu0 %v1857_v3  ;;  %v1266_v34 = vld [vmem:[#allocation5 + $0x70] sm:$0xff]  ;;  %v1288_v3 = vld [vmem:[#allocation5 + $0x120] sm:$0xff] }
 0x2d7   : > { %v981_v7 = vrot.slane %v877_v62, %v2154_v11  ;;  %v1065_v47 = vrot.slane %v940_v22, %v2154_v11  ;;  %v1553_v62 = vpack.c.bf16 %v2073_v9, %v2059_v4  ;;  %v1254_v4 = vld [vmem:[#allocation5 + $0x10] sm:$0xff]  ;;  %v1257_v9 = vld [vmem:[#allocation5 + $0x28] sm:$0xff]  ;;  %v1575_v38 = vpack.c.bf16 %v1266_v34, %v1264_v28  ;;  %v1304_v34 = vld [vmem:[#allocation5 + $0x1a0] sm:$0xff] }
 0x2d8   : > { %v1565_v8 = vpack.c.bf16 %v1259_v24, %v1257_v9  ;;  %v1294_v9 = vld [vmem:[#allocation5 + $0x150] sm:$0xff]  ;;  %v1297_v24 = vld [vmem:[#allocation5 + $0x168] sm:$0xff] }
 0x2d9   : > { %v1088_v27 = vsel %vm1087_vm10, %v981_v7, %v1086_v21  ;;  %v1106_v53 = vsel %vm1081_vm7, %v1065_v47, %v1105_v51  ;;  %1554 = vmatprep.subr.bf16.mxu0 %v1553_v62  ;;  %v1559_v7 = vpack.c.bf16 %v2062_v5, %v2048_v0  ;;  %v1252_v21 = vld [vmem:[#allocation5] sm:$0xff]  ;;  %v1274_v47 = vld [vmem:[#allocation5 + $0xb0] sm:$0xff]  ;;  %v1283_v51 = vld [vmem:[#allocation5 + $0xf8] sm:$0xff] }
 0x2da   : > { %v901_v26 = vpop.permute.xlu0 %900  ;;  %v922_v23 = vpop.permute.xlu1 %921  ;;  %v1115_v31 = vsel %vm1114_vm11, %v1088_v27, 0.0  ;;  %1556 = vmatpush1.bf16.msra.mxu0 %v1555_v63  ;;  %v1563_v2 = vpack.c.bf16 %v1254_v4, %v1252_v21  ;;  %v1263_v27 = vld [vmem:[#allocation5 + $0x58] sm:$0xff]  ;;  %v1260_v5 = vld [vmem:[#allocation5 + $0x40] sm:$0xff] }
 0x2db   : > { %v1013_v30 = vrot.slane %v901_v26, %v2154_v11  ;;  %1116 = vadd.xlane.f32.xlu0 %v1115_v31  ;;  %v1041_v40 = vrot.slane %v922_v23, %v2154_v11  ;;  %1558 = vmatprep.subr.bf16.mxu0 %v1557_v60  ;;  %v1256_v26 = vld [vmem:[#allocation5 + $0x20] sm:$0xff]  ;;  %v1569_v0 = vpack.c.bf16 %v1263_v27, %v1261_v6  ;;  %v1265_v23 = vld [vmem:[#allocation5 + $0x68] sm:$0xff]  ;;  %v1291_v62 = vld [vmem:[#allocation5 + $0x138] sm:$0xff] }
 0x2dc   : > { %1564 = vmatpush1.bf16.msra.mxu1 %v1563_v2  ;;  %v1567_v29 = vpack.c.bf16 %v1258_v1, %v1256_v26  ;;  %v1571_v31 = vpack.c.bf16 %v1262_v13, %v1260_v5  ;;  %v1292_v4 = vld [vmem:[#allocation5 + $0x140] sm:$0xff]  ;;  %v1299_v2 = vld [vmem:[#allocation5 + $0x178] sm:$0xff]  ;;  %v1298_v6 = vld [vmem:[#allocation5 + $0x170] sm:$0xff] }
 0x2dd   : > { %v1095_v41 = vsel %vm1087_vm10, %v1013_v30, %v1094_v36  ;;  %v1101_v39 = vsel %vm1085_vm9, %v1041_v40, %v1100_v49  ;;  %1566 = vmatprep.subr.bf16.mxu1 %v1565_v8  ;;  %v1267_v30 = vld [vmem:[#allocation5 + $0x78] sm:$0xff]  ;;  %v1269_v36 = vld [vmem:[#allocation5 + $0x88] sm:$0xff]  ;;  %v1583_v49 = vpack.c.bf16 %v1274_v47, %v1272_v46  ;;  %v1603_v8 = vpack.c.bf16 %v1294_v9, %v1292_v4  ;;  %v1296_v1 = vld [vmem:[#allocation5 + $0x160] sm:$0xff] }
 0x2de   : > { %v943_v44 = vpop.permute.xlu0 %942  ;;  %v1118_v45 = vsel %vm1114_vm11, %v1095_v41, 0.0  ;;  %v925_v35 = vpop.permute.xlu1 %924  ;;  %1560 = vmatpush1.bf16.msra.mxu0 %v1559_v7  ;;  %v1573_v25 = vpack.c.bf16 %v1267_v30, %v1265_v23  ;;  %v1577_v40 = vpack.c.bf16 %v1271_v37, %v1269_v36  ;;  %v1268_v41 = vld [vmem:[#allocation5 + $0x80] sm:$0xff]  ;;  %v1290_v7 = vld [vmem:[#allocation5 + $0x130] sm:$0xff]  ;;  %v1605_v26 = vpack.c.bf16 %v1299_v2, %v1297_v24  ;;  %v1301_v27 = vld [vmem:[#allocation5 + $0x188] sm:$0xff] }
 0x2df   : > { %1119 = vadd.xlane.f32.xlu1 %v1118_v45  ;;  %v1045_v32 = vrot.slane %v925_v35, %v2154_v11  ;;  %v1069_v17 = vrot.slane %v943_v44, %v2154_v11  ;;  %v1579_v44 = vpack.c.bf16 %v1270_v42, %v1268_v41  ;;  %v1581_v45 = vpack.c.bf16 %v1275_v33, %v1273_v43  ;;  %v1277_v35 = vld [vmem:[#allocation5 + $0xc8] sm:$0xff]  ;;  %v1300_v13 = vld [vmem:[#allocation5 + $0x180] sm:$0xff]  ;;  %v1302_v23 = vld [vmem:[#allocation5 + $0x190] sm:$0xff] }
 0x2e0   : > { %1568 = vmatpush1.bf16.msra.mxu1 %v1567_v29  ;;  %v1599_v21 = vpack.c.bf16 %v1290_v7, %v1288_v3  ;;  %v1303_v29 = vld [vmem:[#allocation5 + $0x198] sm:$0xff]  ;;  %v1305_v30 = vld [vmem:[#allocation5 + $0x1a8] sm:$0xff]  ;;  %v1306_v36 = vld [vmem:[#allocation5 + $0x1b0] sm:$0xff] }
 0x2e1   : > { %v1102_v52 = vsel %vm1087_vm10, %v1045_v32, %v1101_v39  ;;  %v1107_v22 = vsel %vm1083_vm8, %v1069_v17, %v1106_v53  ;;  %1570 = vmatprep.subr.bf16.mxu1 %v1569_v0  ;;  %v1585_v32 = vpack.c.bf16 %v1279_v48, %v1277_v35  ;;  %v1276_v17 = vld [vmem:[#allocation5 + $0xc0] sm:$0xff]  ;;  %v1281_v39 = vld [vmem:[#allocation5 + $0xe8] sm:$0xff]  ;;  %v1607_v0 = vpack.c.bf16 %v1298_v6, %v1296_v1  ;;  %v1310_v43 = vld [vmem:[#allocation5 + $0x1d0] sm:$0xff] }
 0x2e2   : > { %v946_v20 = vpop.permute.xlu0 %945  ;;  %v949_v54 = vpop.permute.xlu1 %948  ;;  %v1121_v56 = vsel %vm1114_vm11, %v1102_v52, 0.0  ;;  %v1589_v52 = vpack.c.bf16 %v1283_v51, %v1281_v39  ;;  %v1280_v53 = vld [vmem:[#allocation5 + $0xe0] sm:$0xff]  ;;  %v1609_v5 = vpack.c.bf16 %v1303_v29, %v1301_v27  ;;  %v1309_v37 = vld [vmem:[#allocation5 + $0x1c8] sm:$0xff]  ;;  %v1314_v2 = vld [vmem:[#allocation5 + $0x1f0] sm:$0xff] }
 0x2e3   : > { %v1073_v55 = vrot.slane %v946_v20, %v2154_v11  ;;  %v1077_v57 = vrot.slane %v949_v54, %v2154_v11  ;;  %1122 = vadd.xlane.f32.xlu0 %v1121_v56  ;;  %v1587_v20 = vpack.c.bf16 %v1278_v50, %v1276_v17  ;;  %v1282_v54 = vld [vmem:[#allocation5 + $0xf0] sm:$0xff]  ;;  %v1287_v56 = vld [vmem:[#allocation5 + $0x118] sm:$0xff]  ;;  %v1308_v42 = vld [vmem:[#allocation5 + $0x1c0] sm:$0xff] }
 0x2e4   : > { %1572 = vmatpush1.bf16.msra.mxu1 %v1571_v31  ;;  %v1307_v31 = vld [vmem:[#allocation5 + $0x1b8] sm:$0xff]  ;;  %v1313_v33 = vld [vmem:[#allocation5 + $0x1e8] sm:$0xff]  ;;  %v1312_v24 = vld [vmem:[#allocation5 + $0x1e0] sm:$0xff] }
 0x2e5   : > { %v1108_v58 = vsel %vm1085_vm9, %v1073_v55, %v1107_v22  ;;  %1574 = vmatprep.subr.bf16.mxu1 %v1573_v25  ;;  %v1285_v55 = vld [vmem:[#allocation5 + $0x108] sm:$0xff]  ;;  %v1591_v22 = vpack.c.bf16 %v1282_v54, %v1280_v53  ;;  %v1611_v25 = vpack.c.bf16 %v1302_v23, %v1300_v13  ;;  %v1613_v28 = vpack.c.bf16 %v1307_v31, %v1305_v30  ;;  %v1714_v13 = vld [vmem:[%s2037_s29] sm:$0xff] }
 0x2e6   : > { %v1109_v59 = vsel %vm1087_vm10, %v1077_v57, %v1108_v58  ;;  %v1593_v57 = vpack.c.bf16 %v1287_v56, %v1285_v55  ;;  %v1284_v58 = vld [vmem:[#allocation5 + $0x100] sm:$0xff]  ;;  %v1715_v30 = vld [vmem:[%s2037_s29 + $0x8] sm:$0xff] }
 0x2e7   : > { %v1124_v61 = vsel %vm1114_vm11, %v1109_v59, 0.0  ;;  %v1286_v59 = vld [vmem:[#allocation5 + $0x110] sm:$0xff] }
 0x2e8   : > { %1125 = vadd.xlane.f32.xlu0 %v1124_v61  ;;  %1576 = vmatpush1.bf16.msra.mxu1 %v1575_v38  ;;  %v1289_v61 = vld [vmem:[#allocation5 + $0x128] sm:$0xff]  ;;  %v1595_v63 = vpack.c.bf16 %v1286_v59, %v1284_v58  ;;  %v1311_v38 = vld [vmem:[#allocation5 + $0x1d8] sm:$0xff] }
 0x2e9   : > { %1578 = vmatprep.subr.bf16.mxu1 %v1577_v40  ;;  %v1597_v60 = vpack.c.bf16 %v1291_v62, %v1289_v61  ;;  %v1615_v40 = vpack.c.bf16 %v1306_v36, %v1304_v34  ;;  %v1617_v41 = vpack.c.bf16 %v1311_v38, %v1309_v37  ;;  %v1717_v36 = vld [vmem:[%s2037_s29 + $0x20] sm:$0xff]  ;;  %v1718_v38 = vld [vmem:[%s2037_s29 + $0x30] sm:$0xff] }
 0x2ec   : > { %1580 = vmatpush1.bf16.msra.mxu1 %v1579_v44  ;;  %v1315_v44 = vld [vmem:[#allocation5 + $0x1f8] sm:$0xff] }
 0x2ed   : > { %1582 = vmatprep.subr.bf16.mxu1 %v1581_v45  ;;  %v1619_v45 = vpack.c.bf16 %v1310_v43, %v1308_v42  ;;  %v1621_v46 = vpack.c.bf16 %v1315_v44, %v1313_v33  ;;  %v1719_v42 = vld [vmem:[%s2037_s29 + $0x18] sm:$0xff]  ;;  %v1720_v33 = vld [vmem:[%s2037_s29 + $0x28] sm:$0xff] }
 0x2f0   : > { %1584 = vmatpush1.bf16.msra.mxu1 %v1583_v49 }
 0x2f1   : > { %1586 = vmatprep.subr.bf16.mxu1 %v1585_v32 }
 0x2f4   : > { %1588 = vmatpush1.bf16.msra.mxu1 %v1587_v20 }
 0x2f5   : > { %1590 = vmatprep.subr.bf16.mxu1 %v1589_v52 }
 0x2f8   : > { %1592 = vmatpush1.bf16.msra.mxu1 %v1591_v22 }
 0x2f9   : > { %1594 = vmatprep.subr.bf16.mxu1 %v1593_v57 }
 0x2fc   : > { %1596 = vmatpush1.bf16.msra.mxu1 %v1595_v63 }
 0x2fd   : > { %1598 = vmatprep.subr.bf16.mxu1 %v1597_v60 }
 0x300   : > { %1600 = vmatpush1.bf16.msra.mxu1 %v1599_v21 }
 0x301   : > { %1602 = vmatprep.subr.bf16.mxu1 %v1601_v12 }
 0x304   : > { %1604 = vmatpush1.bf16.msra.mxu1 %v1603_v8  ;;  %v1623_v8 = vpack.c.bf16 %v1314_v2, %v1312_v24 }
 0x305   : > { %1606 = vmatprep.subr.bf16.mxu1 %v1605_v26 }
 0x308   : > { %1608 = vmatpush1.bf16.msra.mxu1 %v1607_v0 }
 0x309   : > { %1610 = vmatprep.subr.bf16.mxu1 %v1609_v5 }
 0x30c   : > { %1612 = vmatpush1.bf16.msra.mxu1 %v1611_v25 }
 0x30d   : > { %1614 = vmatprep.subr.bf16.mxu1 %v1613_v28  ;;  %v1716_v28 = vld [vmem:[%s2037_s29 + $0x10] sm:$0xff] }
 0x310   : > { %1616 = vmatpush1.bf16.msra.mxu1 %v1615_v40 }
 0x311   : > { %1618 = vmatprep.subr.bf16.mxu1 %v1617_v41 }
 0x314   : > { %1620 = vmatpush1.bf16.msra.mxu1 %v1619_v45  ;;  %v1721_v45 = vld [vmem:[%s2037_s29 + $0x38] sm:$0xff]  ;;  %s1432_s29 = scalar_lea.sflag [#allocation4], %s2031_s11 }
 0x315   : > { %1622 = vmatprep.subr.bf16.mxu1 %v1621_v46 }
 0x318   : > { %1624 = vmatpush1.bf16.msra.mxu1 %v1623_v8 }
 0x368   : > { %v1117_v47 = vpop.xlane.xlu0 %1116 }
 0x369   : > { %v1539_v35 = vmul.f32 -1.442695, %v1117_v47 }
 0x36b   : > { %1690 = vpow2.f32 %v1539_v35 }
 0x36c   : > { %v1120_v48 = vpop.xlane.xlu1 %1119 }
 0x36d   : > { %v1540_v49 = vmul.f32 -1.442695, %v1120_v48 }
 0x36f   : > { %1692 = vpow2.f32 %v1540_v49 }
 0x370   : > { %v1123_v32 = vpop.xlane.xlu0 %1122 }
 0x371   : > { %v1541_v17 = vmul.f32 -1.442695, %v1123_v32 }
 0x373   : > { %1694 = vpow2.f32 %v1541_v17 }
 0x375   : > { %v1126_v50 = vpop.xlane.xlu0 %1125  ;;  %v1691_v51 = vpop.eup %1690 }
 0x376   : > { %v1542_v39 = vmul.f32 -1.442695, %v1126_v50  ;;  %v1139_v53 = vadd.f32 1.0, %v1691_v51 }
 0x378   : > { %1696 = vpow2.f32 %v1542_v39 }
 0x379   : > { %v1693_v20 = vpop.eup %1692 }
 0x37a   : > { %v1140_v52 = vadd.f32 1.0, %v1693_v20 }
 0x37c   : > { %1698 = vrcp.f32 %v1140_v52 }
 0x37d   : > { %v1695_v54 = vpop.eup %1694  ;;  %1700 = vrcp.f32 %v1139_v53 }
 0x37e   : > { %v1141_v55 = vadd.f32 1.0, %v1695_v54 }
 0x380   : > { %1702 = vrcp.f32 %v1141_v55 }
 0x382   : > { %v1697_v56 = vpop.eup %1696 }
 0x383   : > { %v1142_v22 = vadd.f32 1.0, %v1697_v56 }
 0x385   : > { %1704 = vrcp.f32 %v1142_v22 }
 0x386   : > { %v1699_v57 = vpop.eup %1698 }
 0x387   : > { %v1701_v58 = vpop.eup %1700  ;;  %v1152_v59 = vmul.f32 0.03125, %v1699_v57  ;;  %v1401_v34 = vmul.f32 %v1716_v28, %v1699_v57  ;;  %v1402_v43 = vmul.f32 %v1719_v42, %v1699_v57 }
 0x388   : > { %v1151_v62 = vmul.f32 0.03125, %v1701_v58  ;;  %v1399_v23 = vmul.f32 %v1714_v13, %v1701_v58  ;;  %v1400_v31 = vmul.f32 %v1715_v30, %v1701_v58 }
 0x389   : > { %v1166_v60 = vrot.slane %v1152_v59, %v2151_v10 }
 0x38a   : > { %v1703_v61 = vpop.eup %1702  ;;  %v1162_v18 = vrot.slane %v1151_v62, %v2154_v11 }
 0x38b   : > { %v1153_v63 = vmul.f32 0.03125, %v1703_v61  ;;  %v1403_v37 = vmul.f32 %v1717_v36, %v1703_v61  ;;  %v1404_v44 = vmul.f32 %v1720_v33, %v1703_v61 }
 0x38c   : > { %v1167_v21 = vsel %vm445_vm0, %v1166_v60, %v1162_v18 }
 0x38d   : > { %v1171_v7 = vrot.slane %v1153_v63, %v2157_v15 }
 0x38f   : > { %v1705_v3 = vpop.eup %1704  ;;  %v1172_v4 = vsel %vm452_vm1, %v1171_v7, %v1167_v21 }
 0x390   : > { %v1154_v16 = vmul.f32 0.03125, %v1705_v3  ;;  %v1405_v40 = vmul.f32 %v1718_v38, %v1705_v3  ;;  %v1406_v46 = vmul.f32 %v1721_v45, %v1705_v3 }
 0x392   : > { %v1176_v12 = vrot.slane %v1154_v16, %v2161_v19 }
 0x394   : > { %v1177_v9 = vsel %vm459_vm2, %v1176_v12, %v1172_v4 }
 0x395   : > { %1543 = vmatmul.mubr.msk.f32.vlgmr.msra.gmra.mrb[0].mxu0 %vm1178_vm12, %v1177_v9 }
 0x468   : > { %v1247_v10 = vpop.f32.mrb[0].mxu0 }
 0x469   : > { %v1249_v26 = vpop.f32.mrb[1].mxu0 }
 0x46a   : > { %1380 = vmatprep.mubr.f32.mxu1 %v1249_v26 }
 0x46b   : > { %1381 = vmatmul.mubr.f32.vlgmr.msra.gmra.mrb[0].mxu1 %v1247_v10 }
 0x53e   : > { %v1382_v11 = vpop.f32.mrb[0].mxu1 }
 0x53f   : > { %v1544_v15 = vmul.f32 -1.442695, %v1382_v11  ;;  %v1384_v19 = vpop.f32.mrb[1].mxu1 }
 0x540   : > { %v1545_v1 = vmul.f32 -1.442695, %v1384_v19 }
 0x541   : > { %1706 = vpow2.f32 %v1544_v15 }
 0x542   : > { %1708 = vpow2.f32 %v1545_v1 }
 0x54b   : > { %v1707_v6 = vpop.eup %1706 }
 0x54c   : > { %v1709_v27 = vpop.eup %1708  ;;  %v1393_v29 = vadd.f32 1.0, %v1707_v6 }
 0x54d   : > { %v1394_v0 = vadd.f32 1.0, %v1709_v27 }
 0x54e   : > { %1710 = vrcp.f32 %v1393_v29 }
 0x54f   : > { %1712 = vrcp.f32 %v1394_v0 }
 0x558   : > { %v1711_v5 = vpop.eup %1710 }
 0x559   : > { %v1713_v25 = vpop.eup %1712  ;;  %v1410_v41 = vrot.slane %v1711_v5, %v2083_v14 }
 0x55a   : > { %v1414_v47 = vrot.slane %v1713_v25, %v2083_v14 }
 0x55b   : > { %v1415_v35 = vmul.f32 %v1410_v41, %v1399_v23  ;;  %v1417_v48 = vmul.f32 %v1410_v41, %v1401_v34  ;;  %v1419_v49 = vmul.f32 %v1410_v41, %v1403_v37  ;;  %v1421_v32 = vmul.f32 %v1410_v41, %v1405_v40 }
 0x55c   : > { %v1416_v17 = vmul.f32 %v1414_v47, %v1400_v31  ;;  %v1418_v14 = vmul.f32 %v1414_v47, %v1402_v43  ;;  %v1420_v50 = vmul.f32 %v1414_v47, %v1404_v44  ;;  %v1422_v39 = vmul.f32 %v1414_v47, %v1406_v46 }
 0x55d   : > { %1423 = vst [vmem:[%s2350_s25] sm:$0xff] %v1415_v35  ;;  %1425 = vst [vmem:[%s2350_s25 + $0x10] sm:$0xff] %v1417_v48 }
 0x55e   : > { %1427 = vst [vmem:[%s2350_s25 + $0x20] sm:$0xff] %v1419_v49  ;;  %1429 = vst [vmem:[%s2350_s25 + $0x30] sm:$0xff] %v1421_v32 }
 0x55f   : > { %1424 = vst [vmem:[%s2350_s25 + $0x8] sm:$0xff] %v1416_v17  ;;  %1426 = vst [vmem:[%s2350_s25 + $0x18] sm:$0xff] %v1418_v14 }
 0x560   : > { %1428 = vst [vmem:[%s2350_s25 + $0x28] sm:$0xff] %v1420_v50  ;;  %1430 = vst [vmem:[%s2350_s25 + $0x38] sm:$0xff] %v1422_v39 }
 0x561   : > { %1793 = shalt.err (!%p1790_p7)
}
 0x562   : > { %s1794_s9 = scalar_lea.hbm %s2364_s5, 1024  ;;  %s1798_s6 = scalar_lea.hbm %s2422_s4, 2048 }
 0x563   : > { %p1795_p9 = scmp.ne.s32.totalorder %s2364_s5, %s1794_s9  ;;  %p1799_p5 = scmp.lt.u32.totalorder %s2364_s5, %s2422_s4 }
 0x564   : > { %p1800_p11 = scmp.lt.u32.totalorder %s1798_s6, %s1794_s9  ;;  %p1802_p4 = scmp.lt.u32.totalorder %s1794_s9, %s2364_s5 }
 0x565   : > { %p1796_p1 = pnand %p1795_p9, %p1980_p12 }
 0x566   : > { %p1801_p2 = por %p1800_p11, %p1799_p5 }
 0x567   : > { %p1797_p0 = pneg %p1796_p1 }
 0x568   : > { %p1803_p6 = por %p1802_p4, %p1801_p2 }
 0x56a   : > { %p1804_p8 = pnand %p1803_p6, %p1797_p0 }
 0x56c   : > { %1807 = shalt.err (!%p1804_p8)
}
 0x56d   : > { %s1859_s8 = smov 256   ;;  %s1860_s25 = smov 16  }
 0x56e   : > { %1631 = dma.vmem_to_hbm [thread:$0]  (%p1980_p12), %s2366_s14, 1024, %s2364_s5, %s1432_s29, %s1859_s8, %s1859_s8, %s1860_s25  }
 0x56f PF: > { %s1460_s19 = sand.u32 1, %s1838_s15   ;;  %p2437_p10 = scmp.ne.s32.totalorder %s2427_s22, 0 }
 0x570   : > { %p2438_p13 = scmp.ge.s32.totalorder %s1850_s18, 2  ;;  %s1461_s20 = scalar_lea.sflag [#allocation4], %s1460_s19 }
 0x572   : > { %p1642_p3 = pnand %p2438_p13, %p2437_p10 }
 0x574   : > { %1833 = dma.done.wait (!%p1642_p3), %s1461_s20, 1024  }
 0x575   : > { %1835 = vsyncadd (!%p1642_p3), %s1461_s20, 4294966272  ;;  %p18_p7 = scmp.ge.s32.totalorder %s1942_s27, 4   ;;  %s2439_s15 = smov %s1842_s16 }
 0x576   : > { %s2440_s16 = smov %s1846_s17  ;;  %s2441_s17 = smov %s1976_s24 }
 0x577   : > { %s2442_s18 = smov %s1942_s27  ;;  %20 = sbr.rel (!%p18_p7) target bundleno = 6 (0x6), region = 85 }
 0x57e   :  { %1466 = vsyncpa [#allocation3], 1 }
 0x57f   :  { %1468 = vsyncpa [#allocation3 + $0x1], 1 }
 0x580   :  { %1469 = vsyncpa [#allocation6], 1 }
 0x581   :  { %1470 = vsyncpa [#allocation4], 1 }
 0x582   :  { %1472 = vsyncpa [#allocation4 + $0x1], 1 }

</bundles_post_ra>
